<compile_context>
chip_gen: v6e
topology: v6e:2x2x1
jax: 0.10.0
libtpu: 0.0.40
codegen_flags: <defaults>
</compile_context>

<pallas_src>
import jax
import jax.numpy as jnp
from jax.experimental import pallas as pl
from jax.experimental.pallas import tpu as pltpu


def _round_up(x, m):
    return ((x + m - 1) // m) * m


def _vmem_capacity_bytes():
    try:
        return int(pltpu.get_tpu_info().vmem_capacity_bytes)
    except Exception:
        return 64 * 2**20  # conservative (v7x per-TC size); safe on every chip


# --------------------------------------------------------------------------- #
# Kernels
# --------------------------------------------------------------------------- #
def _ffn_kernel_fused(x_ref, w1_ref, b1_ref, w2_ref, b2_ref, o_ref):
    """Whole H in one step: weights grid-constant, no accumulator scratch."""
    h = jnp.dot(x_ref[...], w1_ref[...], preferred_element_type=jnp.float32)
    h = jnp.maximum(h + b1_ref[...], 0.0)
    # TODO(synk): training-mode dropout mask would be applied to `h` here.
    o = jnp.dot(h.astype(w2_ref.dtype), w2_ref[...],
                preferred_element_type=jnp.float32)
    o_ref[...] = (o + b2_ref[...]).astype(o_ref.dtype)


def _ffn_kernel_hsplit(x_ref, w1_ref, b1_ref, w2_ref, b2_ref, o_ref, acc_ref):
    """H tiled along the last ("arbitrary") grid axis; resident f32 accumulator."""
    h_idx = pl.program_id(1)

    @pl.when(h_idx == 0)
    def _():
        acc_ref[...] = jnp.zeros_like(acc_ref)

    h = jnp.dot(x_ref[...], w1_ref[...], preferred_element_type=jnp.float32)
    h = jnp.maximum(h + b1_ref[...], 0.0)
    # TODO(synk): training-mode dropout mask would be applied to `h` here.
    acc_ref[...] += jnp.dot(h.astype(w2_ref.dtype), w2_ref[...],
                            preferred_element_type=jnp.float32)

    @pl.when(h_idx == pl.num_programs(1) - 1)
    def _():
        o_ref[...] = (acc_ref[...] + b2_ref[...]).astype(o_ref.dtype)


# --------------------------------------------------------------------------- #
# Wrapper
# --------------------------------------------------------------------------- #
def prepare_ffn_params(w1, b1, w2, b2, compute_dtype=jnp.bfloat16):
    """Pad weights/biases to 128-multiples and cast ONCE (call at init time).

    w1: (D, H)   b1: (H,)   w2: (H, D)   b2: (D,)
    """
    D, H = w1.shape
    D_pad, H_pad = _round_up(D, 128), _round_up(H, 128)

    def pad2(a, rows, cols):
        if a.shape != (rows, cols):
            a = jnp.pad(a, ((0, rows - a.shape[0]), (0, cols - a.shape[1])))
        return a.astype(compute_dtype)

    def pad1(a, cols):
        if a.shape[0] != cols:
            a = jnp.pad(a, (0, cols - a.shape[0]))
        return a.astype(jnp.float32).reshape(1, cols)

    return dict(w1=pad2(w1, D_pad, H_pad), b1=pad1(b1, H_pad),
                w2=pad2(w2, H_pad, D_pad), b2=pad1(b2, D_pad),
                dim=D, hidden=H)


def positionwise_ffn(x, params, *, tm=None, th=None):
    """x: (B, S, D) -> (B, S, D), params from prepare_ffn_params()."""
    w1p, b1p, w2p, b2p = params["w1"], params["b1"], params["w2"], params["b2"]
    D, H = params["dim"], params["hidden"]
    B, S, Dx = x.shape
    assert Dx == D
    N = B * S
    out_dtype = x.dtype
    cdt = w1p.dtype
    cds = jnp.dtype(cdt).itemsize
    ods = jnp.dtype(out_dtype).itemsize
    D_pad, H_pad = w1p.shape

    vmem_cap = _vmem_capacity_bytes()
    vmem_budget = int(vmem_cap * 0.75)  # headroom for Mosaic internals

    # --- row tile: multiple of 256, minimize padded rows, prefer >=2 row tiles
    #     (megacore on v7x), then the largest tile (amortizes weight DMA).
    if tm is None:
        tm_cap = 1024 if vmem_cap >= 96 * 2**20 else 512
        best = None
        for cand in range(256, tm_cap + 1, 256):
            n_pad = _round_up(N, cand)
            key = (n_pad, 0 if n_pad // cand >= 2 else 1, -cand)
            if best is None or key < best[0]:
                best = (key, cand)
        tm = best[1]
    tm = max(256, _round_up(int(tm), 256))
    N_pad = _round_up(N, tm)

    def footprint(tm_, th_, hsplit):
        return (2 * tm_ * D_pad * cds           # x tile (double-buffered)
                + 2 * tm_ * D_pad * ods         # out tile
                + 2 * D_pad * th_ * cds         # W1 slice
                + 2 * th_ * D_pad * cds         # W2 slice
                + 2 * (H_pad + D_pad) * 4       # biases (f32)
                + (tm_ * D_pad * 4 if hsplit else 0))  # f32 accumulator

    # --- hidden tile: collapse H entirely when the full weights fit in VMEM,
    #     otherwise the largest 128-multiple divisor of H_pad (target 1024).
    if th is None and footprint(tm, H_pad, hsplit=False) <= vmem_budget:
        th = H_pad
    if th is None:
        th = 1024
    th = min(max(128, (int(th) // 128) * 128), H_pad)
    while H_pad % th:
        th -= 128
    collapse = (th == H_pad) and footprint(tm, H_pad, False) <= vmem_budget
    while (not collapse) and footprint(tm, th, True) > vmem_budget:
        if th > 128:
            th -= 128
            while H_pad % th:
                th -= 128
        elif tm > 256:
            tm -= 256
            N_pad = _round_up(N, tm)
        else:
            break

    # --- pad / cast the activations (weights were prepared once at init).
    x2 = x.reshape(N, D)
    if x2.dtype != cdt:
        x2 = x2.astype(cdt)
    if (N_pad, D_pad) != (N, D):
        x2 = jnp.pad(x2, ((0, N_pad - N), (0, D_pad - D)))

    n_row = N_pad // tm
    fp = footprint(tm, th, not collapse)
    vmem_limit = int(min(vmem_cap * 95 // 100,
                         max(32 * 2**20, int(fp * 1.5))))

    cost = pl.CostEstimate(
        flops=4 * N_pad * D_pad * H_pad,
        transcendentals=0,
        bytes_accessed=int(N_pad * D_pad * (cds + ods)
                           + (w1p.size + w2p.size) * cds
                           * (1 if collapse else n_row)
                           + (b1p.size + b2p.size) * 4),
    )

    if collapse:
        grid = (n_row,)
        in_specs = [
            pl.BlockSpec((tm, D_pad), lambda i: (i, 0)),      # x rows
            pl.BlockSpec((D_pad, H_pad), lambda i: (0, 0)),   # W1 (resident)
            pl.BlockSpec((1, H_pad), lambda i: (0, 0)),       # b1
            pl.BlockSpec((H_pad, D_pad), lambda i: (0, 0)),   # W2 (resident)
            pl.BlockSpec((1, D_pad), lambda i: (0, 0)),       # b2
        ]
        out_spec = pl.BlockSpec((tm, D_pad), lambda i: (i, 0))
        scratch = []
        kernel = _ffn_kernel_fused
        semantics = ("parallel",)
    else:
        grid = (n_row, H_pad // th)
        in_specs = [
            pl.BlockSpec((tm, D_pad), lambda i, h: (i, 0)),   # x rows
            pl.BlockSpec((D_pad, th), lambda i, h: (0, h)),   # W1 H-slice
            pl.BlockSpec((1, th), lambda i, h: (0, h)),       # b1 H-slice
            pl.BlockSpec((th, D_pad), lambda i, h: (h, 0)),   # W2 H-slice
            pl.BlockSpec((1, D_pad), lambda i, h: (0, 0)),    # b2
        ]
        out_spec = pl.BlockSpec((tm, D_pad), lambda i, h: (i, 0))
        scratch = [pltpu.VMEM((tm, D_pad), jnp.float32)]
        kernel = _ffn_kernel_hsplit
        semantics = ("parallel", "arbitrary")

    out = pl.pallas_call(
        kernel,
        out_shape=jax.ShapeDtypeStruct((N_pad, D_pad), out_dtype),
        grid_spec=pltpu.PrefetchScalarGridSpec(
            num_scalar_prefetch=0,
            grid=grid,
            in_specs=in_specs,
            out_specs=out_spec,
            scratch_shapes=scratch,
        ),
        compiler_params=pltpu.CompilerParams(
            dimension_semantics=semantics,
            vmem_limit_bytes=vmem_limit,
        ),
        cost_estimate=cost,
    )(x2, w1p, b1p, w2p, b2p)

    if (N_pad, D_pad) != (N, D):
        out = out[:N, :D]
    return out.reshape(B, S, D)


# --------------------------------------------------------------------------- #
# Self-test
# --------------------------------------------------------------------------- #
def _ffn_ref(x, w1, b1, w2, b2):
    D = w1.shape[0]
    h = jnp.maximum(
        jnp.dot(x.reshape(-1, D), w1, precision=jax.lax.Precision.HIGHEST) + b1,
        0.0)
    o = jnp.dot(h, w2, precision=jax.lax.Precision.HIGHEST) + b2
    return o.reshape(x.shape)


if __name__ == "__main__":
    B, S, D, H = 2, 8, 32, 64  # hidden defaults to dim in the module; use 64

    key = jax.random.PRNGKey(0)
    kx, kw1, kb1, kw2, kb2 = jax.random.split(key, 5)

    x = jax.random.normal(kx, (B, S, D), dtype=jnp.float32)

    # nn.Linear(dim, hidden): weight (hidden, dim); we store transposed (dim, hidden)
    bound1 = 1.0 / (D ** 0.5)
    w1 = jax.random.uniform(kw1, (D, H), minval=-bound1, maxval=bound1,
                            dtype=jnp.float32)
    b1 = jax.random.uniform(kb1, (H,), minval=-bound1, maxval=bound1,
                            dtype=jnp.float32)
    bound2 = 1.0 / (H ** 0.5)
    w2 = jax.random.uniform(kw2, (H, D), minval=-bound2, maxval=bound2,
                            dtype=jnp.float32)
    b2 = jax.random.uniform(kb2, (D,), minval=-bound2, maxval=bound2,
                            dtype=jnp.float32)

    ref = _ffn_ref(x, w1, b1, w2, b2)

    # 1) default bf16-on-MXU path (f32 accumulation), fused single-H-step kernel.
    params_bf16 = prepare_ffn_params(w1, b1, w2, b2)  # bf16 compute by default
    y = jax.block_until_ready(positionwise_ffn(x, params_bf16))
    assert jnp.allclose(y, ref, atol=5e-2, rtol=5e-2), "bf16 mismatch vs ref"

    # 2) f32 compute path, fused kernel (tight tolerance).
    params_f32 = prepare_ffn_params(w1, b1, w2, b2, compute_dtype=jnp.float32)
    y32 = jax.block_until_ready(positionwise_ffn(x, params_f32))
    assert jnp.allclose(y32, ref, atol=1e-5, rtol=1e-5), "f32 mismatch vs ref"

    # 3) exercise the H-tiled accumulator kernel explicitly (th < H_pad).
    H2 = 256
    w1b = jax.random.uniform(kw1, (D, H2), minval=-bound1, maxval=bound1,
                             dtype=jnp.float32)
    b1b = jax.random.uniform(kb1, (H2,), minval=-bound1, maxval=bound1,
                             dtype=jnp.float32)
    bound2b = 1.0 / (H2 ** 0.5)
    w2b = jax.random.uniform(kw2, (H2, D), minval=-bound2b, maxval=bound2b,
                             dtype=jnp.float32)
    ref2 = _ffn_ref(x, w1b, b1b, w2b, b2)
    params2 = prepare_ffn_params(w1b, b1b, w2b, b2, compute_dtype=jnp.float32)
    y2 = jax.block_until_ready(positionwise_ffn(x, params2, th=128))
    assert jnp.allclose(y2, ref2, atol=1e-4, rtol=1e-4), "h-split mismatch vs ref"

    print("KERNEL_OK")
</pallas_src>

<mosaic_0001>
module attributes {stable_mosaic.version = 11 : i64} {
  func.func @_ffn_kernel_fused(%arg0: i32, %arg1: memref<256x128xbf16, #tpu.memory_space<vmem>>, %arg2: memref<128x128xbf16, #tpu.memory_space<vmem>>, %arg3: memref<1x128xf32, #tpu.memory_space<vmem>>, %arg4: memref<128x128xbf16, #tpu.memory_space<vmem>>, %arg5: memref<1x128xf32, #tpu.memory_space<vmem>>, %arg6: memref<256x128xf32, #tpu.memory_space<vmem>>) attributes {dimension_semantics = [#tpu.dimension_semantics<parallel>], iteration_bounds = array<i64: 1>, scalar_prefetch = 0 : i64, scratch_operands = 0 : i64, tpu.core_type = #tpu.core_type<tc>, window_params = [{transform_indices = @transform_0, window_bounds = array<i64: 256, 128>}, {pipeline_mode = #tpu.pipeline_mode<synchronous>, transform_indices = @transform_1, window_bounds = array<i64: 128, 128>}, {pipeline_mode = #tpu.pipeline_mode<synchronous>, transform_indices = @transform_2, window_bounds = array<i64: 1, 128>}, {pipeline_mode = #tpu.pipeline_mode<synchronous>, transform_indices = @transform_3, window_bounds = array<i64: 128, 128>}, {pipeline_mode = #tpu.pipeline_mode<synchronous>, transform_indices = @transform_4, window_bounds = array<i64: 1, 128>}, {transform_indices = @transform_5, window_bounds = array<i64: 256, 128>}]} {
    %c0 = arith.constant 0 : index
    %c0_0 = arith.constant 0 : index
    %0 = vector.load %arg1[%c0, %c0_0] : memref<256x128xbf16, #tpu.memory_space<vmem>>, vector<256x128xbf16>
    %c0_1 = arith.constant 0 : index
    %c0_2 = arith.constant 0 : index
    %1 = vector.load %arg2[%c0_1, %c0_2] : memref<128x128xbf16, #tpu.memory_space<vmem>>, vector<128x128xbf16>
    %cst = arith.constant dense<0.000000e+00> : vector<256x128xf32>
    %2 = tpu.matmul %0, %1, %cst {dimension_numbers = #tpu.dot_dimension_numbers<[1], [0], [0], [1], [0, 0, 1, 1], [], []>} : vector<256x128xbf16>, vector<128x128xbf16>, vector<256x128xf32> -> vector<256x128xf32>
    %c0_3 = arith.constant 0 : index
    %c0_4 = arith.constant 0 : index
    %3 = vector.load %arg3[%c0_3, %c0_4] : memref<1x128xf32, #tpu.memory_space<vmem>>, vector<1x128xf32>
    %4 = vector.broadcast %3 : vector<1x128xf32> to vector<256x128xf32>
    %5 = arith.addf %2, %4 : vector<256x128xf32>
    %cst_5 = arith.constant 0.000000e+00 : f32
    %6 = vector.broadcast %cst_5 : f32 to vector<256x128xf32>
    %7 = arith.maximumf %5, %6 : vector<256x128xf32>
    %8 = arith.truncf %7 : vector<256x128xf32> to vector<256x128xbf16>
    %c0_6 = arith.constant 0 : index
    %c0_7 = arith.constant 0 : index
    %9 = vector.load %arg4[%c0_6, %c0_7] : memref<128x128xbf16, #tpu.memory_space<vmem>>, vector<128x128xbf16>
    %cst_8 = arith.constant dense<0.000000e+00> : vector<256x128xf32>
    %10 = tpu.matmul %8, %9, %cst_8 {dimension_numbers = #tpu.dot_dimension_numbers<[1], [0], [0], [1], [0, 0, 1, 1], [], []>} : vector<256x128xbf16>, vector<128x128xbf16>, vector<256x128xf32> -> vector<256x128xf32>
    %c0_9 = arith.constant 0 : index
    %c0_10 = arith.constant 0 : index
    %11 = vector.load %arg5[%c0_9, %c0_10] : memref<1x128xf32, #tpu.memory_space<vmem>>, vector<1x128xf32>
    %12 = vector.broadcast %11 : vector<1x128xf32> to vector<256x128xf32>
    %13 = arith.addf %10, %12 : vector<256x128xf32>
    %c0_11 = arith.constant 0 : index
    %c0_12 = arith.constant 0 : index
    %14 = vector.load %arg6[%c0_11, %c0_12] : memref<256x128xf32, #tpu.memory_space<vmem>>, vector<256x128xf32>
    tpu.vector_store %arg6[%c0_11, %c0_12], %13 {strides = array<i32>} : memref<256x128xf32, #tpu.memory_space<vmem>>, vector<256x128xf32>,
    return
  }
  func.func @transform_0(%arg0: i32) -> (i32, i32) {
    %c0_i32 = arith.constant 0 : i32
    %c0_i32_0 = arith.constant 0 : i32
    return %arg0, %c0_i32 : i32, i32
  }
  func.func @transform_1(%arg0: i32) -> (i32, i32) {
    %c0_i32 = arith.constant 0 : i32
    %c0_i32_0 = arith.constant 0 : i32
    %c0_i32_1 = arith.constant 0 : i32
    return %c0_i32, %c0_i32_0 : i32, i32
  }
  func.func @transform_2(%arg0: i32) -> (i32, i32) {
    %c0_i32 = arith.constant 0 : i32
    %c0_i32_0 = arith.constant 0 : i32
    %c0_i32_1 = arith.constant 0 : i32
    return %c0_i32, %c0_i32_0 : i32, i32
  }
  func.func @transform_3(%arg0: i32) -> (i32, i32) {
    %c0_i32 = arith.constant 0 : i32
    %c0_i32_0 = arith.constant 0 : i32
    %c0_i32_1 = arith.constant 0 : i32
    return %c0_i32, %c0_i32_0 : i32, i32
  }
  func.func @transform_4(%arg0: i32) -> (i32, i32) {
    %c0_i32 = arith.constant 0 : i32
    %c0_i32_0 = arith.constant 0 : i32
    %c0_i32_1 = arith.constant 0 : i32
    return %c0_i32, %c0_i32_0 : i32, i32
  }
  func.func @transform_5(%arg0: i32) -> (i32, i32) {
    %c0_i32 = arith.constant 0 : i32
    %c0_i32_0 = arith.constant 0 : i32
    return %arg0, %c0_i32 : i32, i32
  }
}

</mosaic_0001>

<bundles_post_ra>
// kernel: tpu_custom_call.1
= control target key start
LH: loop header
LB: loop body
LE: loop exit
PB: predicated region body
PF: predicated region fallthrough
CT: control target
= control target key end

     0   :  { %10 = vsyncpa [#allocation3], 0  ;;  %s1181_s0 = inlined_call_operand.hbm [shape: bf16[256,128], index: 0, kind: input, shape index: {}]   ;;  %s1182_s1 = inlined_call_operand.hbm [shape: bf16[128,128], index: 1, kind: input, shape index: {}]   ;;  %s1183_s2 = inlined_call_operand.vmem [shape: f32[1,128], index: 2, kind: input, shape index: {}]   ;;  %s1184_s3 = inlined_call_operand.hbm [shape: bf16[128,128], index: 3, kind: input, shape index: {}]   ;;  %s1185_s4 = inlined_call_operand.vmem [shape: f32[1,128], index: 4, kind: input, shape index: {}]   ;;  %s1186_s5 = inlined_call_operand.hbm [shape: f32[256,128], index: 5, kind: output, shape index: {}]  }
   0x1   :  { %11 = vsyncpa [#allocation6], 0 }
   0x2   :  { %12 = vsyncpa [#allocation4], 0  ;;  %s1057_s18 = smov [#allocation5]   ;;  %s1058_s20 = smov [#allocation2]  }
   0x3   :  { %s30_s19 = sshll.u32 %s1057_s18, 4  ;;  %s18_s21 = sshll.u32 %s1058_s20, 4  ;;  %s31_s19 = int_to_ptr.vmem [resolvable:$true] %s30_s19  ;;  %s19_s21 = int_to_ptr.vmem [resolvable:$true] %s18_s21 }
   0x4   :  { %s979_s22 = scalar_lea.vmem %s31_s19, 1024  ;;  %p984_p1 = scmp.lt.s32.totalorder %s31_s19, %s31_s19 }
   0x5   :  { %p980_p0 = scmp.ne.s32.totalorder %s31_s19, %s979_s22  ;;  %p985_p2 = scmp.lt.s32.totalorder %s979_s22, %s979_s22 }
   0x7   :  { %p986_p3 = por %p985_p2, %p984_p1 }
   0x9   :  { %p987_p4 = pnand %p986_p3, %p980_p0 }
   0xb   :  { %990 = shalt.err (!%p987_p4)
}
   0xc   :  { %s1059_s23 = smov 64   ;;  %s1060_s24 = smov 4  }
   0xd   :  { %36 = dma.hbm_to_vmem [thread:$0]  %s1182_s1, 1024, %s31_s19, [#allocation6], %s1059_s23, %s1059_s23, %s1060_s24  }
   0xe   :  { %s999_s27 = scalar_lea.vmem %s19_s21, 2048  ;;  %p1004_p6 = scmp.lt.s32.totalorder %s19_s21, %s19_s21 }
   0xf   :  { %p1000_p5 = scmp.ne.s32.totalorder %s19_s21, %s999_s27  ;;  %p1005_p7 = scmp.lt.s32.totalorder %s999_s27, %s999_s27 }
  0x11   :  { %p1006_p8 = por %p1005_p7, %p1004_p6 }
  0x13   :  { %p1007_p9 = pnand %p1006_p8, %p1000_p5 }
  0x15   :  { %1010 = shalt.err (!%p1007_p9)
}
  0x16   :  { %24 = dma.hbm_to_vmem [thread:$0]  %s1181_s0, 2048, %s19_s21, [#allocation3], %s1059_s23, %s1059_s23, %s1060_s24  }
  0x17   :  { %s1061_s30 = smov [#allocation7]  }
  0x18   :  { %s44_s6 = sshll.u32 %s1061_s30, 4  ;;  %s45_s6 = int_to_ptr.vmem [resolvable:$true] %s44_s6 }
  0x19   :  { %s1019_s7 = scalar_lea.vmem %s45_s6, 1024  ;;  %p1024_p11 = scmp.lt.s32.totalorder %s45_s6, %s45_s6 }
  0x1a   :  { %p1020_p10 = scmp.ne.s32.totalorder %s45_s6, %s1019_s7  ;;  %p1025_p12 = scmp.lt.s32.totalorder %s1019_s7, %s1019_s7 }
  0x1c   :  { %p1026_p13 = por %p1025_p12, %p1024_p11 }
  0x1e   :  { %p1027_p0 = pnand %p1026_p13, %p1020_p10 }
  0x20   :  { %1030 = shalt.err (!%p1027_p0)
}
  0x21   :  { %50 = dma.hbm_to_vmem [thread:$0]  %s1184_s3, 1024, %s45_s6, [#allocation6], %s1059_s23, %s1059_s23, %s1060_s24  }
  0x22   :  { %1051 = dma.done.wait [#allocation3], 2048  }
  0x23   :  { %1052 = vsyncadd [#allocation3], 4294965248 }
  0x24   :  { %1053 = dma.done.wait [#allocation6], 2048  }
  0x25   :  { %1054 = vsyncadd [#allocation6], 4294965248  ;;  %v939_v0 = vld [vmem:[#allocation5 + $0x38] sm:$0xff]   ;;  %v940_v1 = vld [vmem:[#allocation5 + $0x30] sm:$0xff]  }
  0x26   :  { %835 = vmatprep.subr.bf16.mxu0 %v939_v0  ;;  %v941_v2 = vld [vmem:[#allocation5 + $0x28] sm:$0xff]   ;;  %v942_v3 = vld [vmem:[#allocation5 + $0x20] sm:$0xff]   ;;  %v943_v5 = vld [vmem:[#allocation5 + $0x18] sm:$0xff]  }
  0x27   :  { %836 = vmatpush3.bf16.msra.mxu0 %v939_v0  ;;  %v947_v4 = vld [vmem:[#allocation2] sm:$0xff]   ;;  %v944_v6 = vld [vmem:[#allocation5 + $0x10] sm:$0xff]   ;;  %v945_v7 = vld [vmem:[#allocation5 + $0x8] sm:$0xff]  }
  0x28   :  { %837 = vmatprep.subr.bf16.mxu0 %v940_v1  ;;  %851 = vmatprep.mubr.bf16.mxu0 %v947_v4  ;;  %v946_v8 = vld [vmem:[#allocation5] sm:$0xff]   ;;  %v963_v9 = vld [vmem:[#allocation7 + $0x38] sm:$0xff]   ;;  %v964_v10 = vld [vmem:[#allocation7 + $0x30] sm:$0xff]  }
  0x29   :  { %883 = vmatprep.subr.bf16.mxu1 %v963_v9  ;;  %v948_v11 = vld [vmem:[#allocation2 + $0x8] sm:$0xff]   ;;  %v949_v13 = vld [vmem:[#allocation2 + $0x10] sm:$0xff]   ;;  %v966_v14 = vld [vmem:[#allocation7 + $0x20] sm:$0xff]  }
  0x2a   :  { %884 = vmatpush3.bf16.msra.mxu1 %v963_v9  ;;  %v965_v12 = vld [vmem:[#allocation7 + $0x28] sm:$0xff]   ;;  %v967_v15 = vld [vmem:[#allocation7 + $0x18] sm:$0xff]   ;;  %v951_v17 = vld [vmem:[#allocation2 + $0x20] sm:$0xff]  }
  0x2b   :  { %838 = vmatpush3.bf16.msra.mxu0 %v940_v1  ;;  %885 = vmatprep.subr.bf16.mxu1 %v964_v10  ;;  %v950_v16 = vld [vmem:[#allocation2 + $0x18] sm:$0xff]   ;;  %v952_v18 = vld [vmem:[#allocation2 + $0x28] sm:$0xff]   ;;  %v953_v19 = vld [vmem:[#allocation2 + $0x30] sm:$0xff]  }
  0x2c   :  { %839 = vmatprep.subr.bf16.mxu0 %v941_v2  ;;  %v954_v20 = vld [vmem:[#allocation2 + $0x38] sm:$0xff]   ;;  %v955_v21 = vld [vmem:[#allocation2 + $0x40] sm:$0xff]   ;;  %v956_v22 = vld [vmem:[#allocation2 + $0x48] sm:$0xff]  }
  0x2d   :  { %v957_v23 = vld [vmem:[#allocation2 + $0x50] sm:$0xff]   ;;  %v958_v24 = vld [vmem:[#allocation2 + $0x58] sm:$0xff]   ;;  %v959_v25 = vld [vmem:[#allocation2 + $0x60] sm:$0xff]  }
  0x2e   :  { %886 = vmatpush3.bf16.msra.mxu1 %v964_v10  ;;  %v960_v26 = vld [vmem:[#allocation2 + $0x68] sm:$0xff]   ;;  %v961_v27 = vld [vmem:[#allocation2 + $0x70] sm:$0xff]   ;;  %v962_v28 = vld [vmem:[#allocation2 + $0x78] sm:$0xff]  }
  0x2f   :  { %840 = vmatpush3.bf16.msra.mxu0 %v941_v2  ;;  %887 = vmatprep.subr.bf16.mxu1 %v965_v12  ;;  %v968_v29 = vld [vmem:[#allocation7 + $0x10] sm:$0xff]   ;;  %v969_v30 = vld [vmem:[#allocation7 + $0x8] sm:$0xff]   ;;  %v970_v31 = vld [vmem:[#allocation7] sm:$0xff]  }
  0x30   :  { %841 = vmatprep.subr.bf16.mxu0 %v942_v3  ;;  %v1107_v34 = vld [vmem:[%s1183_s2] ss:$0 sm:$0xff] }
  0x32   :  { %888 = vmatpush3.bf16.msra.mxu1 %v965_v12 }
  0x33   :  { %842 = vmatpush3.bf16.msra.mxu0 %v942_v3  ;;  %889 = vmatprep.subr.bf16.mxu1 %v966_v14 }
  0x34   :  { %843 = vmatprep.subr.bf16.mxu0 %v943_v5 }
  0x36   :  { %890 = vmatpush3.bf16.msra.mxu1 %v966_v14 }
  0x37   :  { %844 = vmatpush3.bf16.msra.mxu0 %v943_v5  ;;  %891 = vmatprep.subr.bf16.mxu1 %v967_v15 }
  0x38   :  { %845 = vmatprep.subr.bf16.mxu0 %v944_v6 }
  0x3a   :  { %892 = vmatpush3.bf16.msra.mxu1 %v967_v15 }
  0x3b   :  { %846 = vmatpush3.bf16.msra.mxu0 %v944_v6  ;;  %893 = vmatprep.subr.bf16.mxu1 %v968_v29 }
  0x3c   :  { %847 = vmatprep.subr.bf16.mxu0 %v945_v7 }
  0x3e   :  { %894 = vmatpush3.bf16.msra.mxu1 %v968_v29 }
  0x3f   :  { %848 = vmatpush3.bf16.msra.mxu0 %v945_v7  ;;  %895 = vmatprep.subr.bf16.mxu1 %v969_v30 }
  0x40   :  { %849 = vmatprep.subr.bf16.mxu0 %v946_v8 }
  0x42   :  { %896 = vmatpush3.bf16.msra.mxu1 %v969_v30 }
  0x43   :  { %850 = vmatpush3.bf16.msra.mxu0 %v946_v8  ;;  %897 = vmatprep.subr.bf16.mxu1 %v970_v31 }
  0x46   :  { %852 = vmatmul.mubr.bf16.vlgmr.msra.gmra.mxu0 %v948_v11  ;;  %898 = vmatpush3.bf16.msra.mxu1 %v970_v31 }
  0x47   :  { %855 = vmatprep.mubr.bf16.mxu0 %v949_v13 }
  0x4e   :  { %856 = vmatmul.mubr.bf16.gmra.mxu0 %v950_v16 }
  0x4f   :  { %859 = vmatprep.mubr.bf16.mxu0 %v951_v17 }
  0x56   :  { %860 = vmatmul.mubr.bf16.gmra.mxu0 %v952_v18 }
  0x57   :  { %863 = vmatprep.mubr.bf16.mxu0 %v953_v19 }
  0x5e   :  { %864 = vmatmul.mubr.bf16.gmra.mxu0 %v954_v20 }
  0x5f   :  { %867 = vmatprep.mubr.bf16.mxu0 %v955_v21 }
  0x66   :  { %868 = vmatmul.mubr.bf16.gmra.mxu0 %v956_v22 }
  0x67   :  { %871 = vmatprep.mubr.bf16.mxu0 %v957_v23 }
  0x6e   :  { %872 = vmatmul.mubr.bf16.gmra.mxu0 %v958_v24 }
  0x6f   :  { %875 = vmatprep.mubr.bf16.mxu0 %v959_v25 }
  0x76   :  { %876 = vmatmul.mubr.bf16.gmra.mxu0 %v960_v26 }
  0x77   :  { %879 = vmatprep.mubr.bf16.mxu0 %v961_v27 }
  0x7e   :  { %880 = vmatmul.mubr.bf16.gmra.mxu0 %v962_v28 }
 0x106   :  { %v853_v32 = vpop.f32.mrf.mxu0 }
 0x107   :  { %v305_v38 = vadd.f32 %v853_v32, %v1107_v34 }
 0x108   :  { %v296_v33 = vpop.f32.mrf.mxu0 }
 0x109   :  { %v297_v36 = vadd.f32 %v1107_v34, %v296_v33  ;;  %v425_v45 = vmax.f32 %v305_v38, 0.0 }
 0x10a   :  { %v854_v35 = vpop.f32.mrf.mxu0 }
 0x10b   :  { %v308_v37 = vadd.f32 %v854_v35, %v1107_v34  ;;  %v423_v43 = vmax.f32 %v297_v36, 0.0 }
 0x10c   :  { %v299_v39 = vpop.f32.mrf.mxu0 }
 0x10d   :  { %v300_v40 = vadd.f32 %v1107_v34, %v299_v39  ;;  %v426_v41 = vmax.f32 %v308_v37, 0.0 }
 0x10e   :  { %v857_v42 = vpop.f32.mrf.mxu0 }
 0x10f   :  { %v424_v44 = vmax.f32 %v300_v40, 0.0  ;;  %v456_v48 = vpack.c.bf16 %v426_v41, %v425_v45  ;;  %v321_v52 = vadd.f32 %v857_v42, %v1107_v34 }
 0x110   :  { %v312_v46 = vpop.f32.mrf.mxu0 }
 0x111   :  { %v455_v47 = vpack.c.bf16 %v424_v44, %v423_v43  ;;  %v313_v50 = vadd.f32 %v1107_v34, %v312_v46  ;;  %v429_v59 = vmax.f32 %v321_v52, 0.0 }
 0x112   :  { %v858_v49 = vpop.f32.mrf.mxu0 }
 0x113   :  { %v324_v51 = vadd.f32 %v858_v49, %v1107_v34  ;;  %899 = vmatprep.mubr.bf16.mxu1 %v455_v47  ;;  %v427_v57 = vmax.f32 %v313_v50, 0.0 }
 0x114   :  { %v315_v53 = vpop.f32.mrf.mxu0  ;;  %900 = vmatmul.mubr.bf16.vlgmr.msra.gmra.mxu1 %v456_v48 }
 0x115   :  { %v316_v54 = vadd.f32 %v1107_v34, %v315_v53  ;;  %v430_v55 = vmax.f32 %v324_v51, 0.0 }
 0x116   :  { %v861_v56 = vpop.f32.mrf.mxu0 }
 0x117   :  { %v428_v58 = vmax.f32 %v316_v54, 0.0  ;;  %v458_v62 = vpack.c.bf16 %v430_v55, %v429_v59  ;;  %v337_v2 = vadd.f32 %v861_v56, %v1107_v34 }
 0x118   :  { %v328_v60 = vpop.f32.mrf.mxu0 }
 0x119   :  { %v457_v61 = vpack.c.bf16 %v428_v58, %v427_v57  ;;  %v329_v0 = vadd.f32 %v1107_v34, %v328_v60  ;;  %v433_v9 = vmax.f32 %v337_v2, 0.0 }
 0x11a   :  { %v862_v63 = vpop.f32.mrf.mxu0 }
 0x11b   :  { %v340_v1 = vadd.f32 %v862_v63, %v1107_v34  ;;  %903 = vmatprep.mubr.bf16.mxu1 %v457_v61  ;;  %v431_v7 = vmax.f32 %v329_v0, 0.0 }
 0x11c   :  { %v331_v3 = vpop.f32.mrf.mxu0  ;;  %904 = vmatmul.mubr.bf16.gmra.mxu1 %v458_v62 }
 0x11d   :  { %v332_v4 = vadd.f32 %v1107_v34, %v331_v3  ;;  %v434_v5 = vmax.f32 %v340_v1, 0.0 }
 0x11e   :  { %v865_v6 = vpop.f32.mrf.mxu0 }
 0x11f   :  { %v432_v8 = vmax.f32 %v332_v4, 0.0  ;;  %v460_v12 = vpack.c.bf16 %v434_v5, %v433_v9  ;;  %v353_v16 = vadd.f32 %v865_v6, %v1107_v34 }
 0x120   :  { %v344_v10 = vpop.f32.mrf.mxu0 }
 0x121   :  { %v459_v11 = vpack.c.bf16 %v432_v8, %v431_v7  ;;  %v345_v14 = vadd.f32 %v1107_v34, %v344_v10  ;;  %v437_v23 = vmax.f32 %v353_v16, 0.0 }
 0x122   :  { %v866_v13 = vpop.f32.mrf.mxu0 }
 0x123   :  { %v356_v15 = vadd.f32 %v866_v13, %v1107_v34  ;;  %907 = vmatprep.mubr.bf16.mxu1 %v459_v11  ;;  %v435_v21 = vmax.f32 %v345_v14, 0.0 }
 0x124   :  { %v347_v17 = vpop.f32.mrf.mxu0  ;;  %908 = vmatmul.mubr.bf16.gmra.mxu1 %v460_v12 }
 0x125   :  { %v348_v18 = vadd.f32 %v1107_v34, %v347_v17  ;;  %v438_v19 = vmax.f32 %v356_v15, 0.0 }
 0x126   :  { %v869_v20 = vpop.f32.mrf.mxu0 }
 0x127   :  { %v436_v22 = vmax.f32 %v348_v18, 0.0  ;;  %v462_v26 = vpack.c.bf16 %v438_v19, %v437_v23  ;;  %v369_v30 = vadd.f32 %v869_v20, %v1107_v34  ;;  %v1144_v18 = vld [vmem:[%s1185_s4] ss:$0 sm:$0xff]  ;;  %s1062_s4 = smov [#allocation8]  }
 0x128   :  { %v360_v24 = vpop.f32.mrf.mxu0  ;;  %s740_s10 = sshll.u32 %s1062_s4, 4  ;;  %s741_s10 = int_to_ptr.vmem [resolvable:$true] %s740_s10 }
 0x129   :  { %v461_v25 = vpack.c.bf16 %v436_v22, %v435_v21  ;;  %v361_v28 = vadd.f32 %v1107_v34, %v360_v24  ;;  %v441_v38 = vmax.f32 %v369_v30, 0.0  ;;  %s1031_s11 = scalar_lea.vmem %s741_s10, 4096  ;;  %p1036_p2 = scmp.lt.s32.totalorder %s741_s10, %s741_s10 }
 0x12a   :  { %v870_v27 = vpop.f32.mrf.mxu0  ;;  %p1032_p1 = scmp.ne.s32.totalorder %s741_s10, %s1031_s11  ;;  %p1037_p3 = scmp.lt.s32.totalorder %s1031_s11, %s1031_s11 }
 0x12b   :  { %v372_v29 = vadd.f32 %v870_v27, %v1107_v34  ;;  %911 = vmatprep.mubr.bf16.mxu1 %v461_v25  ;;  %v439_v36 = vmax.f32 %v361_v28, 0.0 }
 0x12c   :  { %v363_v31 = vpop.f32.mrf.mxu0  ;;  %912 = vmatmul.mubr.bf16.gmra.mxu1 %v462_v26  ;;  %p1038_p4 = por %p1037_p3, %p1036_p2 }
 0x12d   :  { %v364_v32 = vadd.f32 %v1107_v34, %v363_v31  ;;  %v442_v33 = vmax.f32 %v372_v29, 0.0 }
 0x12e   :  { %v873_v35 = vpop.f32.mrf.mxu0  ;;  %p1039_p5 = pnand %p1038_p4, %p1032_p1 }
 0x12f   :  { %v440_v37 = vmax.f32 %v364_v32, 0.0  ;;  %v464_v41 = vpack.c.bf16 %v442_v33, %v441_v38  ;;  %v385_v45 = vadd.f32 %v873_v35, %v1107_v34 }
 0x130   :  { %v376_v39 = vpop.f32.mrf.mxu0 }
 0x131   :  { %v463_v40 = vpack.c.bf16 %v440_v37, %v439_v36  ;;  %v377_v43 = vadd.f32 %v1107_v34, %v376_v39  ;;  %v445_v52 = vmax.f32 %v385_v45, 0.0 }
 0x132   :  { %v874_v42 = vpop.f32.mrf.mxu0 }
 0x133   :  { %v388_v44 = vadd.f32 %v874_v42, %v1107_v34  ;;  %915 = vmatprep.mubr.bf16.mxu1 %v463_v40  ;;  %v443_v50 = vmax.f32 %v377_v43, 0.0 }
 0x134   :  { %v379_v46 = vpop.f32.mrf.mxu0  ;;  %916 = vmatmul.mubr.bf16.gmra.mxu1 %v464_v41 }
 0x135   :  { %v380_v47 = vadd.f32 %v1107_v34, %v379_v46  ;;  %v446_v48 = vmax.f32 %v388_v44, 0.0 }
 0x136   :  { %v877_v49 = vpop.f32.mrf.mxu0 }
 0x137   :  { %v444_v51 = vmax.f32 %v380_v47, 0.0  ;;  %v466_v55 = vpack.c.bf16 %v446_v48, %v445_v52  ;;  %v401_v59 = vadd.f32 %v877_v49, %v1107_v34 }
 0x138   :  { %v392_v53 = vpop.f32.mrf.mxu0 }
 0x139   :  { %v465_v54 = vpack.c.bf16 %v444_v51, %v443_v50  ;;  %v393_v57 = vadd.f32 %v1107_v34, %v392_v53  ;;  %v449_v2 = vmax.f32 %v401_v59, 0.0 }
 0x13a   :  { %v878_v56 = vpop.f32.mrf.mxu0 }
 0x13b   :  { %v404_v58 = vadd.f32 %v878_v56, %v1107_v34  ;;  %919 = vmatprep.mubr.bf16.mxu1 %v465_v54  ;;  %v447_v0 = vmax.f32 %v393_v57, 0.0 }
 0x13c   :  { %v395_v60 = vpop.f32.mrf.mxu0  ;;  %920 = vmatmul.mubr.bf16.gmra.mxu1 %v466_v55 }
 0x13d   :  { %v396_v61 = vadd.f32 %v1107_v34, %v395_v60  ;;  %v450_v62 = vmax.f32 %v404_v58, 0.0 }
 0x13e   :  { %v881_v63 = vpop.f32.mrf.mxu0 }
 0x13f   :  { %v448_v1 = vmax.f32 %v396_v61, 0.0  ;;  %v468_v5 = vpack.c.bf16 %v450_v62, %v449_v2  ;;  %v417_v9 = vadd.f32 %v881_v63, %v1107_v34 }
 0x140   :  { %v408_v3 = vpop.f32.mrf.mxu0 }
 0x141   :  { %v467_v4 = vpack.c.bf16 %v448_v1, %v447_v0  ;;  %v409_v7 = vadd.f32 %v1107_v34, %v408_v3  ;;  %v453_v15 = vmax.f32 %v417_v9, 0.0 }
 0x142   :  { %v882_v6 = vpop.f32.mrf.mxu0 }
 0x143   :  { %v420_v8 = vadd.f32 %v882_v6, %v1107_v34  ;;  %923 = vmatprep.mubr.bf16.mxu1 %v467_v4  ;;  %v451_v13 = vmax.f32 %v409_v7, 0.0 }
 0x144   :  { %v411_v10 = vpop.f32.mrf.mxu0  ;;  %924 = vmatmul.mubr.bf16.gmra.mxu1 %v468_v5 }
 0x145   :  { %v412_v11 = vadd.f32 %v1107_v34, %v411_v10  ;;  %v454_v12 = vmax.f32 %v420_v8, 0.0 }
 0x147   :  { %v452_v14 = vmax.f32 %v412_v11, 0.0  ;;  %v470_v17 = vpack.c.bf16 %v454_v12, %v453_v15 }
 0x149   :  { %v469_v16 = vpack.c.bf16 %v452_v14, %v451_v13 }
 0x14b   :  { %927 = vmatprep.mubr.bf16.mxu1 %v469_v16 }
 0x14c   :  { %928 = vmatmul.mubr.bf16.gmra.mxu1 %v470_v17 }
 0x1d4   :  { %v901_v19 = vpop.f32.mrf.mxu1 }
 0x1d5   :  { %v585_v20 = vadd.f32 %v901_v19, %v1144_v18 }
 0x1d6   :  { %v576_v21 = vpop.f32.mrf.mxu1 }
 0x1d7   :  { %705 = vst [vmem:[#allocation8 + $0x10] sm:$0xff] %v585_v20  ;;  %v577_v34 = vadd.f32 %v1144_v18, %v576_v21 }
 0x1d8   :  { %v902_v22 = vpop.f32.mrf.mxu1 }
 0x1d9   :  { %703 = vst [vmem:[#allocation8] sm:$0xff] %v577_v34  ;;  %v588_v23 = vadd.f32 %v902_v22, %v1144_v18 }
 0x1da   :  { %v579_v24 = vpop.f32.mrf.mxu1 }
 0x1db   :  { %706 = vst [vmem:[#allocation8 + $0x18] sm:$0xff] %v588_v23  ;;  %v580_v25 = vadd.f32 %v1144_v18, %v579_v24 }
 0x1dc   :  { %v905_v26 = vpop.f32.mrf.mxu1 }
 0x1dd   :  { %704 = vst [vmem:[#allocation8 + $0x8] sm:$0xff] %v580_v25  ;;  %v601_v27 = vadd.f32 %v905_v26, %v1144_v18 }
 0x1de   :  { %v592_v28 = vpop.f32.mrf.mxu1 }
 0x1df   :  { %709 = vst [vmem:[#allocation8 + $0x30] sm:$0xff] %v601_v27  ;;  %v593_v29 = vadd.f32 %v1144_v18, %v592_v28 }
 0x1e0   :  { %v906_v30 = vpop.f32.mrf.mxu1 }
 0x1e1   :  { %707 = vst [vmem:[#allocation8 + $0x20] sm:$0xff] %v593_v29  ;;  %v604_v31 = vadd.f32 %v906_v30, %v1144_v18 }
 0x1e2   :  { %v595_v32 = vpop.f32.mrf.mxu1 }
 0x1e3   :  { %710 = vst [vmem:[#allocation8 + $0x38] sm:$0xff] %v604_v31  ;;  %v596_v33 = vadd.f32 %v1144_v18, %v595_v32 }
 0x1e4   :  { %v909_v35 = vpop.f32.mrf.mxu1 }
 0x1e5   :  { %708 = vst [vmem:[#allocation8 + $0x28] sm:$0xff] %v596_v33  ;;  %v617_v36 = vadd.f32 %v909_v35, %v1144_v18 }
 0x1e6   :  { %v608_v37 = vpop.f32.mrf.mxu1 }
 0x1e7   :  { %713 = vst [vmem:[#allocation8 + $0x50] sm:$0xff] %v617_v36  ;;  %v609_v38 = vadd.f32 %v1144_v18, %v608_v37 }
 0x1e8   :  { %v910_v39 = vpop.f32.mrf.mxu1 }
 0x1e9   :  { %711 = vst [vmem:[#allocation8 + $0x40] sm:$0xff] %v609_v38  ;;  %v620_v40 = vadd.f32 %v910_v39, %v1144_v18 }
 0x1ea   :  { %v611_v41 = vpop.f32.mrf.mxu1 }
 0x1eb   :  { %714 = vst [vmem:[#allocation8 + $0x58] sm:$0xff] %v620_v40  ;;  %v612_v42 = vadd.f32 %v1144_v18, %v611_v41 }
 0x1ec   :  { %v913_v43 = vpop.f32.mrf.mxu1 }
 0x1ed   :  { %712 = vst [vmem:[#allocation8 + $0x48] sm:$0xff] %v612_v42  ;;  %v633_v44 = vadd.f32 %v913_v43, %v1144_v18 }
 0x1ee   :  { %v624_v45 = vpop.f32.mrf.mxu1 }
 0x1ef   :  { %717 = vst [vmem:[#allocation8 + $0x70] sm:$0xff] %v633_v44  ;;  %v625_v46 = vadd.f32 %v1144_v18, %v624_v45 }
 0x1f0   :  { %v914_v47 = vpop.f32.mrf.mxu1 }
 0x1f1   :  { %715 = vst [vmem:[#allocation8 + $0x60] sm:$0xff] %v625_v46  ;;  %v636_v48 = vadd.f32 %v914_v47, %v1144_v18 }
 0x1f2   :  { %v627_v49 = vpop.f32.mrf.mxu1 }
 0x1f3   :  { %718 = vst [vmem:[#allocation8 + $0x78] sm:$0xff] %v636_v48  ;;  %v628_v50 = vadd.f32 %v1144_v18, %v627_v49 }
 0x1f4   :  { %v917_v51 = vpop.f32.mrf.mxu1 }
 0x1f5   :  { %716 = vst [vmem:[#allocation8 + $0x68] sm:$0xff] %v628_v50  ;;  %v649_v52 = vadd.f32 %v917_v51, %v1144_v18 }
 0x1f6   :  { %v640_v53 = vpop.f32.mrf.mxu1 }
 0x1f7   :  { %721 = vst [vmem:[#allocation8 + $0x90] sm:$0xff] %v649_v52  ;;  %v641_v54 = vadd.f32 %v1144_v18, %v640_v53 }
 0x1f8   :  { %v918_v55 = vpop.f32.mrf.mxu1 }
 0x1f9   :  { %719 = vst [vmem:[#allocation8 + $0x80] sm:$0xff] %v641_v54  ;;  %v652_v56 = vadd.f32 %v918_v55, %v1144_v18 }
 0x1fa   :  { %v643_v57 = vpop.f32.mrf.mxu1 }
 0x1fb   :  { %722 = vst [vmem:[#allocation8 + $0x98] sm:$0xff] %v652_v56  ;;  %v644_v58 = vadd.f32 %v1144_v18, %v643_v57 }
 0x1fc   :  { %v921_v59 = vpop.f32.mrf.mxu1 }
 0x1fd   :  { %720 = vst [vmem:[#allocation8 + $0x88] sm:$0xff] %v644_v58  ;;  %v665_v60 = vadd.f32 %v921_v59, %v1144_v18 }
 0x1fe   :  { %v656_v61 = vpop.f32.mrf.mxu1 }
 0x1ff   :  { %725 = vst [vmem:[#allocation8 + $0xb0] sm:$0xff] %v665_v60  ;;  %v657_v62 = vadd.f32 %v1144_v18, %v656_v61 }
 0x200   :  { %v922_v63 = vpop.f32.mrf.mxu1 }
 0x201   :  { %723 = vst [vmem:[#allocation8 + $0xa0] sm:$0xff] %v657_v62  ;;  %v668_v0 = vadd.f32 %v922_v63, %v1144_v18 }
 0x202   :  { %v659_v1 = vpop.f32.mrf.mxu1 }
 0x203   :  { %726 = vst [vmem:[#allocation8 + $0xb8] sm:$0xff] %v668_v0  ;;  %v660_v2 = vadd.f32 %v1144_v18, %v659_v1 }
 0x204   :  { %v925_v3 = vpop.f32.mrf.mxu1 }
 0x205   :  { %724 = vst [vmem:[#allocation8 + $0xa8] sm:$0xff] %v660_v2  ;;  %v681_v4 = vadd.f32 %v925_v3, %v1144_v18 }
 0x206   :  { %v672_v5 = vpop.f32.mrf.mxu1 }
 0x207   :  { %729 = vst [vmem:[#allocation8 + $0xd0] sm:$0xff] %v681_v4  ;;  %v673_v6 = vadd.f32 %v1144_v18, %v672_v5 }
 0x208   :  { %v926_v7 = vpop.f32.mrf.mxu1 }
 0x209   :  { %727 = vst [vmem:[#allocation8 + $0xc0] sm:$0xff] %v673_v6  ;;  %v684_v8 = vadd.f32 %v926_v7, %v1144_v18 }
 0x20a   :  { %v675_v9 = vpop.f32.mrf.mxu1 }
 0x20b   :  { %730 = vst [vmem:[#allocation8 + $0xd8] sm:$0xff] %v684_v8  ;;  %v676_v10 = vadd.f32 %v1144_v18, %v675_v9 }
 0x20c   :  { %v929_v11 = vpop.f32.mrf.mxu1 }
 0x20d   :  { %728 = vst [vmem:[#allocation8 + $0xc8] sm:$0xff] %v676_v10  ;;  %v697_v12 = vadd.f32 %v929_v11, %v1144_v18 }
 0x20e   :  { %v688_v13 = vpop.f32.mrf.mxu1 }
 0x20f   :  { %733 = vst [vmem:[#allocation8 + $0xf0] sm:$0xff] %v697_v12  ;;  %v689_v14 = vadd.f32 %v1144_v18, %v688_v13 }
 0x210   :  { %v930_v15 = vpop.f32.mrf.mxu1 }
 0x211   :  { %731 = vst [vmem:[#allocation8 + $0xe0] sm:$0xff] %v689_v14  ;;  %v700_v16 = vadd.f32 %v930_v15, %v1144_v18 }
 0x212   :  { %v691_v17 = vpop.f32.mrf.mxu1 }
 0x213   :  { %734 = vst [vmem:[#allocation8 + $0xf8] sm:$0xff] %v700_v16  ;;  %v692_v19 = vadd.f32 %v1144_v18, %v691_v17 }
 0x215   :  { %732 = vst [vmem:[#allocation8 + $0xe8] sm:$0xff] %v692_v19 }
 0x216   :  { %1042 = shalt.err (!%p1039_p5)
}
 0x217   :  { %s1063_s12 = smov 128   ;;  %s1064_s13 = smov 8  }
 0x218   :  { %746 = dma.vmem_to_hbm [thread:$0]  %s741_s10, 4096, %s1186_s5, [#allocation4], %s1063_s12, %s1063_s12, %s1064_s13  }
 0x219   :  { %1055 = dma.done.wait [#allocation4], 4096  }
 0x21a   :  { %1056 = vsyncadd [#allocation4], 4294963200 }
 0x21b   :  { %750 = vsyncpa [#allocation3], 1 }
 0x21c   :  { %751 = vsyncpa [#allocation6], 1 }
 0x21d   :  { %752 = vsyncpa [#allocation4], 1 }

</bundles_post_ra>
